<compile_context>
chip_gen: v7x
topology: tpu7x:2x2x1
jax: 0.10.0
libtpu: 0.0.40
codegen_flags: <defaults>
</compile_context>

<pallas_src>
import math
import jax
import jax.numpy as jnp
from jax.experimental import pallas as pl
from jax.experimental.pallas import tpu as pltpu


def _round_up(a, m):
    return ((a + m - 1) // m) * m


def _linear_kernel(x_ref, p_ref, o_ref):
    # x_ref: (tg, 128)        lane-dense slab of 128*tg batch elements
    # p_ref: (129, 1280)      rows 0..127: expansion-weight matrix, row 128: bias pattern
    # o_ref: (tg, 1280)       lane-dense, row-major-compatible output slab
    g = x_ref.shape[1]                      # 128
    x = x_ref[...]                          # (tg, 128)
    w_mat = p_ref[0:g, :]                   # (128, 1280)
    bias_row = p_ref[g:g + 1, :]            # (1, 1280)
    # MXU expansion-matmul + VPU broadcast-add; single lane-dense store of the result.
    o_ref[...] = jnp.dot(x, w_mat, preferred_element_type=jnp.float32) + bias_row


def linear_forward(x, weight, bias, *, block_rows=512, min_batch_for_kernel=1024):
    """x: [B, 1] f32, weight: [out, 1] f32 (PyTorch layout), bias: [out] f32 -> [B, out]."""
    B = x.shape[0]
    F, in_features = weight.shape
    assert in_features == 1, "net.fc is nn.Linear(1, 10)"

    G = 128              # batch elements per interleave group (x lane width)
    NCOL = G * F         # 1280 output lanes per group (multiple of 128 -> lane-dense)

    x = x.astype(jnp.float32)
    w_flat = weight.astype(jnp.float32).reshape(F)
    b_flat = bias.astype(jnp.float32).reshape(F)

    if B < min_batch_for_kernel:
        # Tiny batch: one vreg of VPU work -- let XLA fuse it; pallas_call is pure overhead.
        return x * w_flat[None, :] + b_flat[None, :]

    # --- tiling ---------------------------------------------------------------
    rows = -(-B // G)                                   # number of 128-element groups
    tg = min(int(block_rows), _round_up(rows, 8))       # rows of groups per grid step
    tg = _round_up(max(tg, 8), 8)
    # v7x has two TensorCores sharding the "parallel" grid axis: prefer >= 2 tiles.
    if _round_up(rows, tg) // tg < 2 and rows >= 16:
        tg = _round_up((rows + 1) // 2, 8)
    rows_pad = _round_up(rows, tg)
    n_tiles = rows_pad // tg
    total = rows_pad * G

    # --- inputs ---------------------------------------------------------------
    x_flat = x.reshape(-1)
    if total != B:                                      # skip the pad copy when exact fit
        x_flat = jnp.pad(x_flat, (0, total - B))
    x2d = x_flat.reshape(rows_pad, G)                   # lane-dense batch groups

    # Expansion weights + interleaved bias in ONE resident slab (129, 1280), ~660 KB.
    #   M[k, p] = w[p % F] if (p // F == k) else 0 ;   bias_pat[p] = b[p % F]
    p_idx = jnp.arange(NCOL)
    expand = (p_idx[None, :] // F == jnp.arange(G)[:, None]).astype(jnp.float32)
    w_mat = expand * w_flat[p_idx % F][None, :]
    params = jnp.concatenate([w_mat, b_flat[p_idx % F][None, :]], axis=0)   # (G+1, NCOL)

    # --- kernel ---------------------------------------------------------------
    out2d = pl.pallas_call(
        _linear_kernel,
        out_shape=jax.ShapeDtypeStruct((rows_pad, NCOL), jnp.float32),
        grid_spec=pltpu.PrefetchScalarGridSpec(
            num_scalar_prefetch=0,
            grid=(n_tiles,),
            in_specs=[
                pl.BlockSpec((tg, G), lambda i: (i, 0)),            # x groups (tiled)
                pl.BlockSpec((G + 1, NCOL), lambda i: (0, 0)),      # weights+bias (resident)
            ],
            out_specs=pl.BlockSpec((tg, NCOL), lambda i: (i, 0)),
        ),
        compiler_params=pltpu.CompilerParams(
            dimension_semantics=("parallel",),                      # shards across v7x's 2 TCs
        ),
        cost_estimate=pl.CostEstimate(
            flops=2 * rows_pad * G * NCOL,
            transcendentals=0,
            bytes_accessed=4 * (rows_pad * G + (G + 1) * NCOL + rows_pad * NCOL),
        ),
    )(x2d, params)

    # Free, layout-compatible reshape: (rows_pad, 1280) row-major == (total, 10) row-major.
    y = out2d.reshape(total, F)
    if total != B:
        y = y[:B]        # only for ragged batches (the common exact-fit path copies nothing)
    return y


if __name__ == "__main__":
    key = jax.random.PRNGKey(0)
    k_x, k_w, k_b, k_x2, k_x3 = jax.random.split(key, 5)

    in_features, out_features = 1, 10

    # Deterministic parameter init mirroring nn.Linear default:
    # uniform(-1/sqrt(in_features), 1/sqrt(in_features)) = uniform(-1, 1) here.
    bound = 1.0 / math.sqrt(in_features)
    weight = jax.random.uniform(k_w, (out_features, in_features),
                                minval=-bound, maxval=bound, dtype=jnp.float32)
    bias = jax.random.uniform(k_b, (out_features,),
                              minval=-bound, maxval=bound, dtype=jnp.float32)

    # Main check: exact-fit batch (no pad, no slice) exercising a 4-step "parallel" grid.
    B = 4096
    x = jax.random.normal(k_x, (B, in_features), dtype=jnp.float32)
    out = jax.block_until_ready(linear_forward(x, weight, bias, block_rows=8))
    ref = x @ weight.T + bias
    assert out.shape == (B, out_features)
    assert jnp.allclose(out, ref, atol=1e-5, rtol=1e-5)

    # Ragged batch: exercises padding + >=2-tile clamp + tail slice.
    B2 = 5000
    x_ragged = jax.random.normal(k_x3, (B2, in_features), dtype=jnp.float32)
    out_ragged = jax.block_until_ready(linear_forward(x_ragged, weight, bias))
    ref_ragged = x_ragged @ weight.T + bias
    assert out_ragged.shape == (B2, out_features)
    assert jnp.allclose(out_ragged, ref_ragged, atol=1e-5, rtol=1e-5)

    # Tiny-batch path (falls back to fused XLA, per perf review).
    x_small = jax.random.normal(k_x2, (8, in_features), dtype=jnp.float32)
    out_small = jax.block_until_ready(linear_forward(x_small, weight, bias))
    ref_small = x_small @ weight.T + bias
    assert jnp.allclose(out_small, ref_small, atol=1e-5, rtol=1e-5)

    print("KERNEL_OK")
</pallas_src>

<mosaic_0001>
module attributes {stable_mosaic.version = 11 : i64} {
  func.func @_linear_kernel(%arg0: i32, %arg1: memref<8x128xf32, #tpu.memory_space<vmem>>, %arg2: memref<129x1280xf32, #tpu.memory_space<vmem>>, %arg3: memref<8x1280xf32, #tpu.memory_space<vmem>>) attributes {dimension_semantics = [#tpu.dimension_semantics<parallel>], iteration_bounds = array<i64: 4>, scalar_prefetch = 0 : i64, scratch_operands = 0 : i64, tpu.core_type = #tpu.core_type<tc>, window_params = [{transform_indices = @transform_0, window_bounds = array<i64: 8, 128>}, {pipeline_mode = #tpu.pipeline_mode<synchronous>, transform_indices = @transform_1, window_bounds = array<i64: 129, 1280>}, {transform_indices = @transform_2, window_bounds = array<i64: 8, 1280>}]} {
    %c0 = arith.constant 0 : index
    %c0_0 = arith.constant 0 : index
    %0 = vector.load %arg1[%c0, %c0_0] : memref<8x128xf32, #tpu.memory_space<vmem>>, vector<8x128xf32>
    %c0_1 = arith.constant 0 : index
    %c0_2 = arith.constant 0 : index
    %1 = vector.load %arg2[%c0_1, %c0_2] : memref<129x1280xf32, #tpu.memory_space<vmem>>, vector<128x1280xf32>
    %c128 = arith.constant 128 : index
    %c0_3 = arith.constant 0 : index
    %2 = vector.load %arg2[%c128, %c0_3] : memref<129x1280xf32, #tpu.memory_space<vmem>>, vector<1x1280xf32>
    %cst = arith.constant dense<0.000000e+00> : vector<8x1280xf32>
    %3 = tpu.matmul %0, %1, %cst {dimension_numbers = #tpu.dot_dimension_numbers<[1], [0], [0], [1], [0, 0, 1, 1], [], []>} : vector<8x128xf32>, vector<128x1280xf32>, vector<8x1280xf32> -> vector<8x1280xf32>
    %4 = vector.broadcast %2 : vector<1x1280xf32> to vector<8x1280xf32>
    %5 = arith.addf %3, %4 : vector<8x1280xf32>
    %c0_4 = arith.constant 0 : index
    %c0_5 = arith.constant 0 : index
    %6 = vector.load %arg3[%c0_4, %c0_5] : memref<8x1280xf32, #tpu.memory_space<vmem>>, vector<8x1280xf32>
    tpu.vector_store %arg3[%c0_4, %c0_5], %5 {strides = array<i32>} : memref<8x1280xf32, #tpu.memory_space<vmem>>, vector<8x1280xf32>,
    return
  }
  func.func @transform_0(%arg0: i32) -> (i32, i32) {
    %c0_i32 = arith.constant 0 : i32
    %c0_i32_0 = arith.constant 0 : i32
    return %arg0, %c0_i32 : i32, i32
  }
  func.func @transform_1(%arg0: i32) -> (i32, i32) {
    %c0_i32 = arith.constant 0 : i32
    %c0_i32_0 = arith.constant 0 : i32
    %c0_i32_1 = arith.constant 0 : i32
    return %c0_i32, %c0_i32_0 : i32, i32
  }
  func.func @transform_2(%arg0: i32) -> (i32, i32) {
    %c0_i32 = arith.constant 0 : i32
    %c0_i32_0 = arith.constant 0 : i32
    return %arg0, %c0_i32 : i32, i32
  }
}

</mosaic_0001>

<bundles_post_ra>
// kernel: tpu_custom_call.1
= control target key start
LH: loop header
LB: loop body
LE: loop exit
PB: predicated region body
PF: predicated region fallthrough
CT: control target
= control target key end

     0   :  { %7 = vsyncpa [#allocation3], 0  ;;  %s1454_s0 = inlined_call_operand.hbm [shape: f32[32,128], index: 0, kind: input, shape index: {}]   ;;  %s1455_s1 = inlined_call_operand.hbm [shape: f32[129,1280], index: 1, kind: input, shape index: {}]   ;;  %s1456_s2 = inlined_call_operand.hbm [shape: f32[32,1280], index: 2, kind: output, shape index: {}]  }
   0x1   :  { %9 = vsyncpa [#allocation3 + $0x1], 0 }
   0x2   :  { %10 = vsyncpa [#allocation6], 0 }
   0x3   :  { %11 = vsyncpa [#allocation4], 0 }
   0x4   :  { %13 = vsyncpa [#allocation4 + $0x1], 0  ;;  %s1238_s9 = smov 0   ;;  %s1240_s10 = smov 0  }
   0x5   :  { %s1242_s11 = smov 0   ;;  %s1244_s12 = smov 0  }
   0x6 LB: > { %s1259_s13 = sadd.s32 4294967295, %s1215_s12   ;;  %s853_s14 = sadd.s32 4294967294, %s1215_s12   ;;  %s1215_s12 = sphi %s1244_s12, %s1475_s12   ;;  %s1211_s11 = sphi %s1242_s11, %s1474_s11   ;;  %s1207_s10 = sphi %s1240_s10, %s1473_s10   ;;  %s1203_s9 = sphi %s1238_s9, %s1472_s9  }
   0x7   : > { %p39_p0 = scmp.ne.s32.totalorder %s1207_s10, %s1203_s9  ;;  %p1457_p1 = scmp.eq.s32.totalorder %s1259_s13, 0 }
   0x8   : > { %p90_p3 = scmp.eq.s32.totalorder %s853_s14, 3  ;;  %p854_p5 = scmp.ge.s32.totalorder %s1215_s12, 1 }
   0x9   : > { %p1268_p4 = por %p1457_p1, %p39_p0  ;;  %p97_p7 = scmp.lt.s32.totalorder %s1215_s12, 5 }
   0xa   : > { %p1273_p6 = por %p90_p3, %p39_p0  ;;  %s1217_s18 = smov [#allocation5]  }
   0xb   : > { %s1460_s15 = scalar_select %p1268_p4, 1, 0 }
   0xc   : > { %s1461_s16 = scalar_select %p1273_p6, 1, 0 }
   0xd   : > { %p1278_p8 = pnand %p854_p5, %p97_p7  ;;  %s109_s19 = sshll.u32 %s1217_s18, 4  ;;  %s110_s19 = int_to_ptr.vmem [resolvable:$true] %s109_s19 }
   0xe   : > { %s1291_s21 = sadd.s32 1, %s1215_s12   ;;  %s26_s22 = sadd.s32 1, %s1211_s11 }
   0xf   : > { %s1462_s17 = scalar_select %p1278_p8, 1, 0 }
  0x10   : > { %p1035_p9 = pneg %p1278_p8  ;;  %s23_s23 = ssub.s32 %s1215_s12, %s1291_s21 }
  0x11   : > { %s1087_s26 = scalar_lea.hbm %s1455_s1, 21760 }
  0x12   : > { %p1286_p10 = pnand %p1035_p9, %p1457_p1  ;;  %p1088_p11 = scmp.ne.s32.totalorder %s1455_s1, %s1087_s26 }
  0x13   : > { %p1094_p3 = scmp.lt.u32.totalorder %s1087_s26, %s1455_s1 }
  0x14   : > { %p1089_p12 = pneg %p1286_p10 }
  0x16   : > { %p1090_p13 = pnand %p1089_p12, %p1088_p11 }
  0x18   : > { %p1091_p0 = pneg %p1090_p13 }
  0x1a   : > { %p1096_p5 = pnand %p1094_p3, %p1091_p0 }
  0x1c   : > { %1099 = shalt.err (!%p1096_p5)
}
  0x1d   : > { %s1100_s3 = scalar_lea.vmem %s110_s19, 21760  ;;  %p1108_p2 = scmp.lt.s32.totalorder %s110_s19, %s110_s19 }
  0x1e   : > { %p1101_p7 = scmp.ne.s32.totalorder %s110_s19, %s1100_s3  ;;  %p1109_p6 = scmp.lt.s32.totalorder %s1100_s3, %s1100_s3 }
  0x20   : > { %p1103_p9 = pnand %p1101_p7, %p1089_p12  ;;  %p1110_p4 = por %p1109_p6, %p1108_p2 }
  0x22   : > { %p1104_p1 = pneg %p1103_p9 }
  0x24   : > { %p1111_p8 = pnand %p1110_p4, %p1104_p1 }
  0x26   : > { %1114 = shalt.err (!%p1111_p8)
}
  0x27   : > { %s1218_s4 = smov 1280   ;;  %s1219_s5 = smov 80  }
  0x28   : > { %1038 = dma.hbm_to_vmem [thread:$0]  (!%p1286_p10), %s1455_s1, 21760, %s110_s19, [#allocation6], %s1218_s4, %s1218_s4, %s1219_s5  }
  0x29   : > { %p24_p11 = scmp.eq.s32.totalorder %s23_s23, 0  ;;  %p33_p2 = scmp.ne.s32.totalorder %s1211_s11, %s1207_s10 }
  0x2a   : > { %p34_p1 = scmp.eq.s32.totalorder %s1215_s12, 0  ;;  %p1048_p4 = scmp.lt.s32.totalorder %s1215_s12, 4 }
  0x2b   : > { %s1317_s8 = scalar_select %p24_p11, %s1211_s11, %s26_s22  }
  0x2c   : > { %p35_p6 = por %p34_p1, %p33_p2  ;;  %p1464_p8 = scmp.eq.s32.totalorder %s1259_s13, 3 }
  0x2d   : > { %s123_s18 = sand.u32 1, %s1211_s11   ;;  %s858_s24 = sshll.u32 %s1215_s12, 7 }
  0x2e   : > { %p1321_p12 = por %p1464_p8, %p33_p2  ;;  %s857_s25 = sshll.u32 %s123_s18, 3 }
  0x2f   : > { %s1330_s27 = scalar_lea.hbm %s1454_s0, %s858_s24  ;;  %s127_s19 = scalar_lea.vmem [#allocation2], %s857_s25 }
  0x30   : > { %s134_s22 = sshll.u32 %s127_s19, 4  ;;  %p1332_p10 = pnand %p1048_p4, %p35_p6  ;;  %s1336_s22 = int_to_ptr.vmem [resolvable:$true] %s134_s22 }
  0x31   : > { %s124_s28 = scalar_lea.sflag [#allocation3], %s123_s18  ;;  %s1115_s29 = scalar_lea.hbm %s1330_s27, 128 }
  0x32   : > { %p1116_p13 = scmp.ne.s32.totalorder %s1330_s27, %s1115_s29  ;;  %p1117_p0 = pneg %p1332_p10 }
  0x33   : > { %s1120_s4 = scalar_lea.hbm %s1454_s0, 512  ;;  %p1121_p7 = scmp.lt.u32.totalorder %s1330_s27, %s1454_s0 }
  0x34   : > { %p1118_p3 = pnand %p1117_p0, %p1116_p13  ;;  %p1122_p9 = scmp.lt.u32.totalorder %s1120_s4, %s1115_s29 }
  0x35   : > { %p1124_p2 = scmp.lt.u32.totalorder %s1115_s29, %s1330_s27 }
  0x36   : > { %p1119_p5 = pneg %p1118_p3  ;;  %p1123_p11 = por %p1122_p9, %p1121_p7 }
  0x38   : > { %p1125_p1 = por %p1124_p2, %p1123_p11 }
  0x3a   : > { %p1126_p4 = pnand %p1125_p1, %p1119_p5 }
  0x3c   : > { %1129 = shalt.err (!%p1126_p4)
}
  0x3d   : > { %s1130_s7 = scalar_lea.vmem %s1336_s22, 128  ;;  %s1220_s18 = smov [#allocation2]  }
  0x3e   : > { %p1131_p6 = scmp.ne.s32.totalorder %s1336_s22, %s1130_s7  ;;  %s1135_s24 = sshll.u32 %s1220_s18, 4  ;;  %s1136_s24 = int_to_ptr.vmem [resolvable:$false] %s1135_s24 }
  0x3f   : > { %s1137_s25 = scalar_lea.vmem %s1136_s24, 256  ;;  %p1138_p3 = scmp.lt.s32.totalorder %s1336_s22, %s1136_s24 }
  0x40   : > { %p1133_p8 = pnand %p1131_p6, %p1117_p0  ;;  %p1139_p7 = scmp.lt.s32.totalorder %s1137_s25, %s1130_s7 }
  0x42   : > { %p1134_p13 = pneg %p1133_p8  ;;  %p1140_p9 = por %p1139_p7, %p1138_p3 }
  0x44   : > { %p1141_p11 = pnand %p1140_p9, %p1134_p13 }
  0x46   : > { %1144 = shalt.err (!%p1141_p11)
}
  0x47   : > { %1042 = dma.hbm_to_vmem [thread:$0]  (!%p1332_p10), %s1330_s27, 128, %s1336_s22, %s124_s28  }
  0x48   : > { %p1467_p5 = scmp.ne.s32.totalorder %s1462_s17, 0 }
  0x49   : > { %s1366_s20 = sand.u32 (!%p1467_p5), 1, %s1207_s10   ;;  %p1468_p0 = scmp.ne.s32.totalorder (!%p1467_p5), %s1460_s15, 0 }
  0x4a   : > { %143 = sbr.rel (%p1467_p5) target bundleno = 413 (0x19d), region = 28  ;;  %s860_s26 = sshll.u32 (!%p1467_p5), %s1366_s20, 3 }
  0x4b   : > { %s146_s19 = scalar_lea.sflag (!%p1467_p5), [#allocation3], %s1366_s20  ;;  %s1370_s29 = scalar_lea.vmem (!%p1467_p5), [#allocation2], %s860_s26 }
  0x51   : > { %1190 = dma.done.wait (%p1468_p0), %s146_s19, 128  }
  0x52   : > { %1192 = vsyncadd (%p1468_p0), %s146_s19, 4294967168  ;;  %p1469_p10 = scmp.eq.s32.totalorder %s1259_s13, 0 }
  0x54   : > { %1194 = dma.done.wait (%p1469_p10), [#allocation6], 21760   ;;  %p1470_p2 = pmov %p1469_p10 }
  0x55   : > { %v1221_v0 = vmov 0.0   ;;  %v176_v1 = vld [vmem:[#allocation5 + $0x8] sm:$0xff]  ;;  %v186_v2 = vld [vmem:[#allocation5 + $0x58] sm:$0xff]  ;;  %v175_v3 = vld [vmem:[#allocation5] sm:$0xff]  ;;  %s1025_s15 = smul.u32 80, %s1366_s20  ;;  %s759_s3 = scalar_lea.sflag [#allocation4], %s1366_s20 }
  0x56   : > { %1196 = vsyncadd (%p1470_p2), [#allocation6], 4294945536  ;;  %457 = vmatprep.mubr.f32.mxu0 %v1221_v0  ;;  %528 = vmatprep.mubr.f32.mxu1 %v1221_v0  ;;  %v865_v4 = vpack.c.bf16 %v186_v2, %v176_v1  ;;  %v185_v5 = vld [vmem:[#allocation5 + $0x50] sm:$0xff]  ;;  %v196_v6 = vld [vmem:[#allocation5 + $0xa8] sm:$0xff]  ;;  %s1026_s27 = smul.u32 1280, %s1259_s13  ;;  %s1222_s13 = smov [#allocation7]  }
  0x57   : > { %v206_v7 = vld [vmem:[#allocation5 + $0xf8] sm:$0xff]  ;;  %v867_v8 = vpack.c.bf16 %v185_v5, %v175_v3  ;;  %v195_v10 = vld [vmem:[#allocation5 + $0xa0] sm:$0xff]  ;;  %v205_v11 = vld [vmem:[#allocation5 + $0xf0] sm:$0xff]  ;;  %s1394_s17 = scalar_lea.vmem [#allocation7], %s1025_s15  ;;  %s1149_s5 = sshll.u32 %s1222_s13, 4  ;;  %s1150_s5 = int_to_ptr.vmem [resolvable:$false] %s1149_s5 }
  0x58   : > { %v869_v9 = vpack.c.bf16 %v206_v7, %v196_v6  ;;  %v216_v12 = vld [vmem:[#allocation5 + $0x148] sm:$0xff]  ;;  %866 = vmatprep.subr.bf16.mxu0 %v865_v4  ;;  %v226_v13 = vld [vmem:[#allocation5 + $0x198] sm:$0xff]  ;;  %v871_v14 = vpack.c.bf16 %v205_v11, %v195_v10  ;;  %v215_v16 = vld [vmem:[#allocation5 + $0x140] sm:$0xff]  ;;  %s773_s22 = sshll.u32 %s1394_s17, 4  ;;  %s1409_s30 = scalar_lea.hbm %s1456_s2, %s1026_s27  ;;  %s1411_s22 = int_to_ptr.vmem [resolvable:$true] %s773_s22 }
  0x59   : > { %868 = vmatpush1.bf16.msra.mxu0 %v867_v8  ;;  %v873_v15 = vpack.c.bf16 %v226_v13, %v216_v12  ;;  %v225_v17 = vld [vmem:[#allocation5 + $0x190] sm:$0xff]  ;;  %v236_v18 = vld [vmem:[#allocation5 + $0x1e8] sm:$0xff]  ;;  %v246_v19 = vld [vmem:[#allocation5 + $0x238] sm:$0xff]  ;;  %s1145_s4 = scalar_lea.vmem %s1411_s22, 1280  ;;  %s1151_s6 = scalar_lea.vmem %s1150_s5, 2560 }
  0x5a   : > { %870 = vmatprep.subr.bf16.mxu0 %v869_v9  ;;  %v875_v20 = vpack.c.bf16 %v225_v17, %v215_v16  ;;  %v877_v21 = vpack.c.bf16 %v246_v19, %v236_v18  ;;  %v235_v22 = vld [vmem:[#allocation5 + $0x1e0] sm:$0xff]  ;;  %v245_v23 = vld [vmem:[#allocation5 + $0x230] sm:$0xff]  ;;  %v256_v24 = vld [vmem:[#allocation5 + $0x288] sm:$0xff]  ;;  %p1146_p1 = scmp.ne.s32.totalorder %s1411_s22, %s1145_s4  ;;  %p1152_p8 = scmp.lt.s32.totalorder %s1411_s22, %s1150_s5 }
  0x5b   : > { %v266_v25 = vld [vmem:[#allocation5 + $0x2d8] sm:$0xff]  ;;  %v188_v27 = vld [vmem:[#allocation5 + $0x68] sm:$0xff]  ;;  %v177_v28 = vld [vmem:[#allocation5 + $0x10] sm:$0xff]  ;;  %v879_v29 = vpack.c.bf16 %v245_v23, %v235_v22  ;;  %p1153_p13 = scmp.lt.s32.totalorder %s1151_s6, %s1145_s4 }
  0x5c   : > { %v178_v26 = vld [vmem:[#allocation5 + $0x18] sm:$0xff]  ;;  %v255_v30 = vld [vmem:[#allocation5 + $0x280] sm:$0xff]  ;;  %v265_v31 = vld [vmem:[#allocation5 + $0x2d0] sm:$0xff]  ;;  %v881_v34 = vpack.c.bf16 %v266_v25, %v256_v24  ;;  %p1147_p4 = pnand %p1146_p1, %p1321_p12 }
  0x5d   : > { %872 = vmatpush1.bf16.msra.mxu0 %v871_v14  ;;  %v897_v32 = vpack.c.bf16 %v188_v27, %v178_v26  ;;  %v187_v33 = vld [vmem:[#allocation5 + $0x60] sm:$0xff]  ;;  %v276_v35 = vld [vmem:[#allocation5 + $0x328] sm:$0xff]  ;;  %v286_v36 = vld [vmem:[#allocation5 + $0x378] sm:$0xff]  ;;  %v883_v44 = vpack.c.bf16 %v265_v31, %v255_v30  ;;  %p1154_p3 = por %p1153_p13, %p1152_p8 }
  0x5e   : > { %874 = vmatprep.subr.bf16.mxu0 %v873_v15  ;;  %v899_v37 = vpack.c.bf16 %v187_v33, %v177_v28  ;;  %v198_v38 = vld [vmem:[#allocation5 + $0xb8] sm:$0xff]  ;;  %v208_v39 = vld [vmem:[#allocation5 + $0x108] sm:$0xff]  ;;  %v197_v40 = vld [vmem:[#allocation5 + $0xb0] sm:$0xff]  ;;  %v885_v48 = vpack.c.bf16 %v286_v36, %v276_v35  ;;  %p1148_p6 = pneg %p1147_p4 }
  0x5f   : > { %898 = vmatprep.subr.bf16.mxu1 %v897_v32  ;;  %v207_v41 = vld [vmem:[#allocation5 + $0x100] sm:$0xff]  ;;  %v901_v42 = vpack.c.bf16 %v208_v39, %v198_v38  ;;  %v218_v46 = vld [vmem:[#allocation5 + $0x158] sm:$0xff]  ;;  %v228_v47 = vld [vmem:[#allocation5 + $0x1a8] sm:$0xff] }
  0x60   : > { %900 = vmatpush1.bf16.msra.mxu1 %v899_v37  ;;  %v903_v43 = vpack.c.bf16 %v207_v41, %v197_v40  ;;  %v275_v45 = vld [vmem:[#allocation5 + $0x320] sm:$0xff]  ;;  %v285_v49 = vld [vmem:[#allocation5 + $0x370] sm:$0xff]  ;;  %v905_v50 = vpack.c.bf16 %v228_v47, %v218_v46  ;;  %v296_v53 = vld [vmem:[#allocation5 + $0x3c8] sm:$0xff]  ;;  %p1155_p7 = pnand %p1154_p3, %p1148_p6 }
  0x61   : > { %876 = vmatpush1.bf16.msra.mxu0 %v875_v20  ;;  %902 = vmatprep.subr.bf16.mxu1 %v901_v42  ;;  %v217_v51 = vld [vmem:[#allocation5 + $0x150] sm:$0xff]  ;;  %v227_v52 = vld [vmem:[#allocation5 + $0x1a0] sm:$0xff]  ;;  %v306_v54 = vld [vmem:[#allocation5 + $0x418] sm:$0xff]  ;;  %v887_v58 = vpack.c.bf16 %v285_v49, %v275_v45 }
  0x62   : > { %878 = vmatprep.subr.bf16.mxu0 %v877_v21  ;;  %v907_v55 = vpack.c.bf16 %v227_v52, %v217_v51  ;;  %v238_v56 = vld [vmem:[#allocation5 + $0x1f8] sm:$0xff]  ;;  %v248_v57 = vld [vmem:[#allocation5 + $0x248] sm:$0xff]  ;;  %v237_v60 = vld [vmem:[#allocation5 + $0x1f0] sm:$0xff]  ;;  %v889_v62 = vpack.c.bf16 %v306_v54, %v296_v53 }
  0x63   : > { %v909_v59 = vpack.c.bf16 %v248_v57, %v238_v56  ;;  %v247_v61 = vld [vmem:[#allocation5 + $0x240] sm:$0xff]  ;;  %v305_v1 = vld [vmem:[#allocation5 + $0x410] sm:$0xff]  ;;  %v258_v2 = vld [vmem:[#allocation5 + $0x298] sm:$0xff] }
  0x64   : > { %904 = vmatpush1.bf16.msra.mxu1 %v903_v43  ;;  %v295_v63 = vld [vmem:[#allocation5 + $0x3c0] sm:$0xff]  ;;  %v316_v3 = vld [vmem:[#allocation5 + $0x468] sm:$0xff]  ;;  %v326_v4 = vld [vmem:[#allocation5 + $0x4b8] sm:$0xff]  ;;  %v911_v6 = vpack.c.bf16 %v247_v61, %v237_v60 }
  0x65   : > { %880 = vmatpush1.bf16.msra.mxu0 %v879_v29  ;;  %906 = vmatprep.subr.bf16.mxu1 %v905_v50  ;;  %v268_v5 = vld [vmem:[#allocation5 + $0x2e8] sm:$0xff]  ;;  %v891_v7 = vpack.c.bf16 %v305_v1, %v295_v63  ;;  %v315_v8 = vld [vmem:[#allocation5 + $0x460] sm:$0xff]  ;;  %v257_v10 = vld [vmem:[#allocation5 + $0x290] sm:$0xff]  ;;  %v893_v12 = vpack.c.bf16 %v326_v4, %v316_v3 }
  0x66   : > { %882 = vmatprep.subr.bf16.mxu0 %v881_v34  ;;  %v913_v9 = vpack.c.bf16 %v268_v5, %v258_v2  ;;  %v267_v11 = vld [vmem:[#allocation5 + $0x2e0] sm:$0xff]  ;;  %v325_v13 = vld [vmem:[#allocation5 + $0x4b0] sm:$0xff]  ;;  %v278_v14 = vld [vmem:[#allocation5 + $0x338] sm:$0xff] }
  0x67   : > { %v288_v15 = vld [vmem:[#allocation5 + $0x388] sm:$0xff]  ;;  %v190_v17 = vld [vmem:[#allocation5 + $0x78] sm:$0xff]  ;;  %v915_v18 = vpack.c.bf16 %v267_v11, %v257_v10  ;;  %v895_v19 = vpack.c.bf16 %v325_v13, %v315_v8  ;;  %v179_v20 = vld [vmem:[#allocation5 + $0x20] sm:$0xff] }
  0x68   : > { %908 = vmatpush1.bf16.msra.mxu1 %v907_v55  ;;  %v180_v16 = vld [vmem:[#allocation5 + $0x28] sm:$0xff]  ;;  %v917_v21 = vpack.c.bf16 %v288_v15, %v278_v14  ;;  %v277_v22 = vld [vmem:[#allocation5 + $0x330] sm:$0xff]  ;;  %v287_v23 = vld [vmem:[#allocation5 + $0x380] sm:$0xff] }
  0x69   : > { %884 = vmatpush1.bf16.msra.mxu0 %v883_v44  ;;  %910 = vmatprep.subr.bf16.mxu1 %v909_v59  ;;  %v929_v24 = vpack.c.bf16 %v190_v17, %v180_v16  ;;  %v189_v25 = vld [vmem:[#allocation5 + $0x70] sm:$0xff]  ;;  %v298_v26 = vld [vmem:[#allocation5 + $0x3d8] sm:$0xff]  ;;  %v308_v27 = vld [vmem:[#allocation5 + $0x428] sm:$0xff]  ;;  %v919_v31 = vpack.c.bf16 %v287_v23, %v277_v22 }
  0x6a   : > { %886 = vmatprep.subr.bf16.mxu0 %v885_v48  ;;  %v200_v28 = vld [vmem:[#allocation5 + $0xc8] sm:$0xff]  ;;  %v210_v29 = vld [vmem:[#allocation5 + $0x118] sm:$0xff]  ;;  %v931_v32 = vpack.c.bf16 %v189_v25, %v179_v20  ;;  %v199_v33 = vld [vmem:[#allocation5 + $0xc0] sm:$0xff]  ;;  %v921_v34 = vpack.c.bf16 %v308_v27, %v298_v26 }
  0x6b   : > { %v1383_v30 = vld [vmem:[%s1370_s29] sm:$0xff]  ;;  %v307_v36 = vld [vmem:[#allocation5 + $0x420] sm:$0xff]  ;;  %v933_v37 = vpack.c.bf16 %v210_v29, %v200_v28  ;;  %v328_v40 = vld [vmem:[#allocation5 + $0x4c8] sm:$0xff] }
  0x6c   : > { %912 = vmatpush1.bf16.msra.mxu1 %v911_v6  ;;  %v297_v35 = vld [vmem:[#allocation5 + $0x3d0] sm:$0xff]  ;;  %v318_v39 = vld [vmem:[#allocation5 + $0x478] sm:$0xff]  ;;  %v220_v41 = vld [vmem:[#allocation5 + $0x168] sm:$0xff] }
  0x6d   : > { %888 = vmatpush1.bf16.msra.mxu0 %v887_v58  ;;  %914 = vmatprep.subr.bf16.mxu1 %v913_v9  ;;  %v209_v38 = vld [vmem:[#allocation5 + $0x110] sm:$0xff]  ;;  %v230_v42 = vld [vmem:[#allocation5 + $0x1b8] sm:$0xff]  ;;  %v923_v43 = vpack.c.bf16 %v307_v36, %v297_v35  ;;  %v219_v45 = vld [vmem:[#allocation5 + $0x160] sm:$0xff]  ;;  %v925_v46 = vpack.c.bf16 %v328_v40, %v318_v39 }
  0x6e   : > { %890 = vmatprep.subr.bf16.mxu0 %v889_v62  ;;  %v935_v44 = vpack.c.bf16 %v209_v38, %v199_v33  ;;  %v317_v47 = vld [vmem:[#allocation5 + $0x470] sm:$0xff]  ;;  %v327_v48 = vld [vmem:[#allocation5 + $0x4c0] sm:$0xff]  ;;  %v937_v49 = vpack.c.bf16 %v230_v42, %v220_v41  ;;  %v182_v51 = vld [vmem:[#allocation5 + $0x38] sm:$0xff] }
  0x6f   : > { %v229_v50 = vld [vmem:[#allocation5 + $0x1b0] sm:$0xff]  ;;  %v192_v52 = vld [vmem:[#allocation5 + $0x88] sm:$0xff]  ;;  %v250_v54 = vld [vmem:[#allocation5 + $0x258] sm:$0xff]  ;;  %v927_v55 = vpack.c.bf16 %v327_v48, %v317_v47 }
  0x70   : > { %916 = vmatpush1.bf16.msra.mxu1 %v915_v18  ;;  %v240_v53 = vld [vmem:[#allocation5 + $0x208] sm:$0xff]  ;;  %v939_v56 = vpack.c.bf16 %v229_v50, %v219_v45  ;;  %v239_v57 = vld [vmem:[#allocation5 + $0x200] sm:$0xff]  ;;  %v961_v58 = vpack.c.bf16 %v192_v52, %v182_v51  ;;  %v181_v59 = vld [vmem:[#allocation5 + $0x30] sm:$0xff] }
  0x71   : > { %892 = vmatpush1.bf16.msra.mxu0 %v891_v7  ;;  %918 = vmatprep.subr.bf16.mxu1 %v917_v21  ;;  %v191_v60 = vld [vmem:[#allocation5 + $0x80] sm:$0xff]  ;;  %v941_v61 = vpack.c.bf16 %v250_v54, %v240_v53  ;;  %v249_v62 = vld [vmem:[#allocation5 + $0x250] sm:$0xff]  ;;  %v202_v63 = vld [vmem:[#allocation5 + $0xd8] sm:$0xff] }
  0x72   : > { %894 = vmatprep.subr.bf16.mxu0 %v893_v12  ;;  %v212_v1 = vld [vmem:[#allocation5 + $0x128] sm:$0xff]  ;;  %v270_v3 = vld [vmem:[#allocation5 + $0x2f8] sm:$0xff]  ;;  %v963_v4 = vpack.c.bf16 %v191_v60, %v181_v59  ;;  %v943_v5 = vpack.c.bf16 %v249_v62, %v239_v57  ;;  %v259_v6 = vld [vmem:[#allocation5 + $0x2a0] sm:$0xff] }
  0x73   : > { %v260_v2 = vld [vmem:[#allocation5 + $0x2a8] sm:$0xff]  ;;  %v965_v7 = vpack.c.bf16 %v212_v1, %v202_v63  ;;  %v201_v8 = vld [vmem:[#allocation5 + $0xd0] sm:$0xff]  ;;  %v211_v9 = vld [vmem:[#allocation5 + $0x120] sm:$0xff] }
  0x74   : > { %920 = vmatpush1.bf16.msra.mxu1 %v919_v31  ;;  %v945_v10 = vpack.c.bf16 %v270_v3, %v260_v2  ;;  %v269_v11 = vld [vmem:[#allocation5 + $0x2f0] sm:$0xff]  ;;  %v222_v12 = vld [vmem:[#allocation5 + $0x178] sm:$0xff]  ;;  %v232_v13 = vld [vmem:[#allocation5 + $0x1c8] sm:$0xff]  ;;  %v967_v16 = vpack.c.bf16 %v211_v9, %v201_v8 }
  0x75   : > { %896 = vmatpush1.bf16.msra.mxu0 %v895_v19  ;;  %922 = vmatprep.subr.bf16.mxu1 %v921_v34  ;;  %v280_v14 = vld [vmem:[#allocation5 + $0x348] sm:$0xff]  ;;  %v290_v15 = vld [vmem:[#allocation5 + $0x398] sm:$0xff]  ;;  %v947_v17 = vpack.c.bf16 %v269_v11, %v259_v6  ;;  %v279_v18 = vld [vmem:[#allocation5 + $0x340] sm:$0xff]  ;;  %v969_v19 = vpack.c.bf16 %v232_v13, %v222_v12 }
  0x76   : > { %930 = vmatprep.subr.bf16.mxu0 %v929_v24  ;;  %v221_v20 = vld [vmem:[#allocation5 + $0x170] sm:$0xff]  ;;  %v231_v21 = vld [vmem:[#allocation5 + $0x1c0] sm:$0xff]  ;;  %v949_v22 = vpack.c.bf16 %v290_v15, %v280_v14  ;;  %v242_v24 = vld [vmem:[#allocation5 + $0x218] sm:$0xff] }
  0x77   : > { %v289_v23 = vld [vmem:[#allocation5 + $0x390] sm:$0xff]  ;;  %v252_v25 = vld [vmem:[#allocation5 + $0x268] sm:$0xff]  ;;  %v310_v27 = vld [vmem:[#allocation5 + $0x438] sm:$0xff]  ;;  %v971_v28 = vpack.c.bf16 %v231_v21, %v221_v20 }
  0x78   : > { %458 = vmatmul.mubr.f32.vlgmr.msra.gmra.mrb[0].mxu0 %v1383_v30  ;;  %924 = vmatpush1.bf16.msra.mxu1 %v923_v43  ;;  %v300_v26 = vld [vmem:[#allocation5 + $0x3e8] sm:$0xff]  ;;  %v951_v29 = vpack.c.bf16 %v289_v23, %v279_v18  ;;  %v299_v31 = vld [vmem:[#allocation5 + $0x3e0] sm:$0xff]  ;;  %v241_v33 = vld [vmem:[#allocation5 + $0x210] sm:$0xff] }
  0x79   : > { %932 = vmatpush1.bf16.msra.mxu0 %v931_v32  ;;  %599 = vmatprep.mubr.f32.mxu0 %v1221_v0  ;;  %v973_v32 = vpack.c.bf16 %v252_v25, %v242_v24  ;;  %v251_v34 = vld [vmem:[#allocation5 + $0x260] sm:$0xff]  ;;  %v953_v35 = vpack.c.bf16 %v310_v27, %v300_v26  ;;  %v309_v36 = vld [vmem:[#allocation5 + $0x430] sm:$0xff]  ;;  %v272_v38 = vld [vmem:[#allocation5 + $0x308] sm:$0xff] }
  0x7a   : > { %934 = vmatprep.subr.bf16.mxu0 %v933_v37  ;;  %926 = vmatprep.subr.bf16.mxu1 %v925_v46  ;;  %v262_v37 = vld [vmem:[#allocation5 + $0x2b8] sm:$0xff]  ;;  %v320_v39 = vld [vmem:[#allocation5 + $0x488] sm:$0xff]  ;;  %v975_v41 = vpack.c.bf16 %v251_v34, %v241_v33  ;;  %v955_v42 = vpack.c.bf16 %v309_v36, %v299_v31  ;;  %v319_v43 = vld [vmem:[#allocation5 + $0x480] sm:$0xff] }
  0x7b   : > { %v330_v40 = vld [vmem:[#allocation5 + $0x4d8] sm:$0xff]  ;;  %v261_v45 = vld [vmem:[#allocation5 + $0x2b0] sm:$0xff]  ;;  %v271_v46 = vld [vmem:[#allocation5 + $0x300] sm:$0xff] }
  0x7c   : > { %928 = vmatpush1.bf16.msra.mxu1 %v927_v55  ;;  %v957_v47 = vpack.c.bf16 %v330_v40, %v320_v39  ;;  %v329_v48 = vld [vmem:[#allocation5 + $0x4d0] sm:$0xff]  ;;  %v292_v50 = vld [vmem:[#allocation5 + $0x3a8] sm:$0xff]  ;;  %v194_v52 = vld [vmem:[#allocation5 + $0x98] sm:$0xff]  ;;  %v979_v53 = vpack.c.bf16 %v271_v46, %v261_v45 }
  0x7d   : > { %936 = vmatpush1.bf16.msra.mxu0 %v935_v44  ;;  %962 = vmatprep.subr.bf16.mxu1 %v961_v58  ;;  %v977_v44 = vpack.c.bf16 %v272_v38, %v262_v37  ;;  %v184_v51 = vld [vmem:[#allocation5 + $0x48] sm:$0xff]  ;;  %v959_v54 = vpack.c.bf16 %v329_v48, %v319_v43  ;;  %v183_v55 = vld [vmem:[#allocation5 + $0x40] sm:$0xff]  ;;  %v281_v57 = vld [vmem:[#allocation5 + $0x350] sm:$0xff] }
  0x7e   : > { %938 = vmatprep.subr.bf16.mxu0 %v937_v49  ;;  %v282_v49 = vld [vmem:[#allocation5 + $0x358] sm:$0xff]  ;;  %v291_v58 = vld [vmem:[#allocation5 + $0x3a0] sm:$0xff]  ;;  %v993_v59 = vpack.c.bf16 %v194_v52, %v184_v51  ;;  %v193_v60 = vld [vmem:[#allocation5 + $0x90] sm:$0xff] }
  0x7f   : > { %529 = vmatmul.mubr.f32.vlgmr.msra.gmra.mrb[0].mxu1 %v1383_v30  ;;  %v312_v62 = vld [vmem:[#allocation5 + $0x448] sm:$0xff]  ;;  %v214_v1 = vld [vmem:[#allocation5 + $0x138] sm:$0xff]  ;;  %v983_v2 = vpack.c.bf16 %v291_v58, %v281_v57  ;;  %v995_v3 = vpack.c.bf16 %v193_v60, %v183_v55  ;;  %v301_v6 = vld [vmem:[#allocation5 + $0x3f0] sm:$0xff] }
  0x80   : > { %964 = vmatpush1.bf16.msra.mxu1 %v963_v4  ;;  %670 = vmatprep.mubr.f32.mxu1 %v1221_v0  ;;  %v204_v63 = vld [vmem:[#allocation5 + $0xe8] sm:$0xff]  ;;  %v203_v4 = vld [vmem:[#allocation5 + $0xe0] sm:$0xff]  ;;  %v213_v9 = vld [vmem:[#allocation5 + $0x130] sm:$0xff] }
  0x81   : > { %940 = vmatpush1.bf16.msra.mxu0 %v939_v56  ;;  %966 = vmatprep.subr.bf16.mxu1 %v965_v7  ;;  %v981_v56 = vpack.c.bf16 %v292_v50, %v282_v49  ;;  %v311_v7 = vld [vmem:[#allocation5 + $0x440] sm:$0xff]  ;;  %v997_v8 = vpack.c.bf16 %v214_v1, %v204_v63  ;;  %v332_v11 = vld [vmem:[#allocation5 + $0x4e8] sm:$0xff]  ;;  %v234_v13 = vld [vmem:[#allocation5 + $0x1d8] sm:$0xff]  ;;  %v999_v15 = vpack.c.bf16 %v213_v9, %v203_v4 }
  0x82   : > { %942 = vmatprep.subr.bf16.mxu0 %v941_v61  ;;  %v302_v61 = vld [vmem:[#allocation5 + $0x3f8] sm:$0xff]  ;;  %v224_v12 = vld [vmem:[#allocation5 + $0x188] sm:$0xff]  ;;  %v987_v14 = vpack.c.bf16 %v311_v7, %v301_v6  ;;  %v331_v18 = vld [vmem:[#allocation5 + $0x4e0] sm:$0xff] }
  0x83   : > { %v223_v20 = vld [vmem:[#allocation5 + $0x180] sm:$0xff]  ;;  %v233_v21 = vld [vmem:[#allocation5 + $0x1d0] sm:$0xff]  ;;  %v254_v23 = vld [vmem:[#allocation5 + $0x278] sm:$0xff] }
  0x84   : > { %968 = vmatpush1.bf16.msra.mxu1 %v967_v16  ;;  %v1003_v25 = vpack.c.bf16 %v233_v21, %v223_v20  ;;  %v243_v27 = vld [vmem:[#allocation5 + $0x220] sm:$0xff]  ;;  %v274_v31 = vld [vmem:[#allocation5 + $0x318] sm:$0xff]  ;;  %v293_v40 = vld [vmem:[#allocation5 + $0x3b0] sm:$0xff] }
  0x85   : > { %944 = vmatpush1.bf16.msra.mxu0 %v943_v5  ;;  %970 = vmatprep.subr.bf16.mxu1 %v969_v19  ;;  %v985_v5 = vpack.c.bf16 %v312_v62, %v302_v61  ;;  %v1001_v19 = vpack.c.bf16 %v234_v13, %v224_v12  ;;  %v263_v34 = vld [vmem:[#allocation5 + $0x2c0] sm:$0xff]  ;;  %v294_v36 = vld [vmem:[#allocation5 + $0x3b8] sm:$0xff]  ;;  %v313_v46 = vld [vmem:[#allocation5 + $0x450] sm:$0xff] }
  0x86   : > { %946 = vmatprep.subr.bf16.mxu0 %v945_v10  ;;  %v322_v10 = vld [vmem:[#allocation5 + $0x498] sm:$0xff]  ;;  %v283_v39 = vld [vmem:[#allocation5 + $0x360] sm:$0xff]  ;;  %v333_v52 = vld [vmem:[#allocation5 + $0x4f0] sm:$0xff] }
  0x87   : > { %v989_v16 = vpack.c.bf16 %v332_v11, %v322_v10  ;;  %v1015_v43 = vpack.c.bf16 %v293_v40, %v283_v39  ;;  %v303_v45 = vld [vmem:[#allocation5 + $0x400] sm:$0xff]  ;;  %v334_v48 = vld [vmem:[#allocation5 + $0x4f8] sm:$0xff] }
  0x88   : > { %972 = vmatpush1.bf16.msra.mxu1 %v971_v28  ;;  %v253_v28 = vld [vmem:[#allocation5 + $0x270] sm:$0xff]  ;;  %v1019_v49 = vpack.c.bf16 %v313_v46, %v303_v45  ;;  %v323_v51 = vld [vmem:[#allocation5 + $0x4a0] sm:$0xff] }
  0x89   : > { %948 = vmatpush1.bf16.msra.mxu0 %v947_v17  ;;  %974 = vmatprep.subr.bf16.mxu1 %v973_v32  ;;  %v321_v17 = vld [vmem:[#allocation5 + $0x490] sm:$0xff]  ;;  %v1007_v32 = vpack.c.bf16 %v253_v28, %v243_v27  ;;  %v340_v27 = vld [vmem:[#allocation5 + $0x540] ss:$8 sm:$0x3] }
  0x8a   : > { %950 = vmatprep.subr.bf16.mxu0 %v949_v22  ;;  %v244_v22 = vld [vmem:[#allocation5 + $0x228] sm:$0xff]  ;;  %v991_v24 = vpack.c.bf16 %v331_v18, %v321_v17 }
  0x8b   : > { %v1005_v26 = vpack.c.bf16 %v254_v23, %v244_v22  ;;  %v337_v57 = vld [vmem:[#allocation5 + $0x500] ss:$8 sm:$0xf0] }
  0x8c   : > { %976 = vmatpush1.bf16.msra.mxu1 %v975_v41  ;;  %v304_v41 = vld [vmem:[#allocation5 + $0x408] sm:$0xff] }
  0x8d   : > { %952 = vmatpush1.bf16.msra.mxu0 %v951_v29  ;;  %978 = vmatprep.subr.bf16.mxu1 %v977_v44  ;;  %v264_v29 = vld [vmem:[#allocation5 + $0x2c8] sm:$0xff] }
  0x8e   : > { %954 = vmatprep.subr.bf16.mxu0 %v953_v35  ;;  %v1009_v33 = vpack.c.bf16 %v274_v31, %v264_v29  ;;  %v284_v35 = vld [vmem:[#allocation5 + $0x368] sm:$0xff] }
  0x8f   : > { %v1013_v38 = vpack.c.bf16 %v294_v36, %v284_v35 }
  0x90   : > { %980 = vmatpush1.bf16.msra.mxu1 %v979_v53  ;;  %v1023_v53 = vpack.c.bf16 %v333_v52, %v323_v51 }
  0x91   : > { %956 = vmatpush1.bf16.msra.mxu0 %v955_v42  ;;  %982 = vmatprep.subr.bf16.mxu1 %v981_v56  ;;  %v314_v42 = vld [vmem:[#allocation5 + $0x458] sm:$0xff] }
  0x92   : > { %958 = vmatprep.subr.bf16.mxu0 %v957_v47  ;;  %v1017_v44 = vpack.c.bf16 %v314_v42, %v304_v41  ;;  %v324_v47 = vld [vmem:[#allocation5 + $0x4a8] sm:$0xff] }
  0x93   : > { %v1021_v50 = vpack.c.bf16 %v334_v48, %v324_v47  ;;  %v336_v56 = vld [vmem:[#allocation5 + $0x500] ss:$8 sm:$0xf] }
  0x94   : > { %984 = vmatpush1.bf16.msra.mxu1 %v983_v2  ;;  %v338_v58 = vor.u32 %v337_v57, %v336_v56 }
  0x95   : > { %960 = vmatpush1.bf16.msra.mxu0 %v959_v54  ;;  %986 = vmatprep.subr.bf16.mxu1 %v985_v5  ;;  %v343_v54 = vlaneseq }
  0x96   : > { %994 = vmatprep.subr.bf16.mxu0 %v993_v59 }
  0x97   : > { %v344_v55 = vshrl.u32 %v343_v54, 7 }
  0x98   : > { %600 = vmatmul.mubr.f32.vlgmr.msra.gmra.mrb[2].mxu0 %v1383_v30  ;;  %988 = vmatpush1.bf16.msra.mxu1 %v987_v14 }
  0x99   : > { %996 = vmatpush1.bf16.msra.mxu0 %v995_v3  ;;  %741 = vmatprep.mubr.f32.mxu0 %v1221_v0  ;;  %v273_v0 = vld [vmem:[#allocation5 + $0x310] sm:$0xff]  ;;  %v345_v59 = vsub.s32 0, %v344_v55  ;;  %v349_v60 = vsub.s32 1, %v344_v55  ;;  %v357_v4 = vsub.s32 3, %v344_v55  ;;  %v361_v11 = vsub.s32 4, %v344_v55 }
  0x9a   : > { %998 = vmatprep.subr.bf16.mxu0 %v997_v8  ;;  %990 = vmatprep.subr.bf16.mxu1 %v989_v16  ;;  %v1011_v37 = vpack.c.bf16 %v273_v0, %v263_v34  ;;  %v365_v12 = vsub.s32 5, %v344_v55  ;;  %v373_v20 = vsub.s32 7, %v344_v55 }
  0x9b   : > { %v346_v61 = vrot.slane %v338_v58, %v345_v59  ;;  %v350_v62 = vrot.slane %v338_v58, %v349_v60  ;;  %v358_v6 = vrot.slane %v338_v58, %v357_v4  ;;  %v362_v13 = vrot.slane %v338_v58, %v361_v11 }
  0x9c   : > { %992 = vmatpush1.bf16.msra.mxu1 %v991_v24  ;;  %v366_v14 = vrot.slane %v338_v58, %v365_v12  ;;  %v374_v22 = vrot.slane %v338_v58, %v373_v20  ;;  %v378_v28 = vrot.slane %v340_v27, %v345_v59  ;;  %v382_v29 = vrot.slane %v340_v27, %v349_v60 }
  0x9d   : > { %1000 = vmatpush1.bf16.msra.mxu0 %v999_v15 }
  0x9e   : > { %1002 = vmatprep.subr.bf16.mxu0 %v1001_v19  ;;  %v369_v19 = vsub.s32 6, %v344_v55 }
  0x9f   : > { %671 = vmatmul.mubr.f32.vlgmr.msra.gmra.mrb[2].mxu1 %v1383_v30 }
  0xa0   : > { %v370_v21 = vrot.slane %v338_v58, %v369_v19 }
  0xa1   : > { %1004 = vmatpush1.bf16.msra.mxu0 %v1003_v25 }
  0xa2   : > { %1006 = vmatprep.subr.bf16.mxu0 %v1005_v26 }
  0xa5   : > { %1008 = vmatpush1.bf16.msra.mxu0 %v1007_v32 }
  0xa6   : > { %1010 = vmatprep.subr.bf16.mxu0 %v1009_v33 }
  0xa9   : > { %1012 = vmatpush1.bf16.msra.mxu0 %v1011_v37 }
  0xaa   : > { %1014 = vmatprep.subr.bf16.mxu0 %v1013_v38 }
  0xad   : > { %1016 = vmatpush1.bf16.msra.mxu0 %v1015_v43 }
  0xae   : > { %1018 = vmatprep.subr.bf16.mxu0 %v1017_v44 }
  0xb1   : > { %1020 = vmatpush1.bf16.msra.mxu0 %v1019_v49 }
  0xb2   : > { %1022 = vmatprep.subr.bf16.mxu0 %v1021_v50 }
  0xb5   : > { %1024 = vmatpush1.bf16.msra.mxu0 %v1023_v53 }
  0xb8   : > { %742 = vmatmul.mubr.f32.vlgmr.msra.gmra.mrb[4].mxu0 %v1383_v30  ;;  %v353_v30 = vsub.s32 2, %v344_v55 }
  0xba   : > { %v354_v5 = vrot.slane %v338_v58, %v353_v30 }
 0x14b   : > { %v459_v63 = vpop.f32.mrb[0].mxu0 }
 0x14c   : > { %v460_v1 = vadd.f32 %v459_v63, %v346_v61  ;;  %v461_v2 = vpop.f32.mrb[1].mxu0 }
 0x14d   : > { %v462_v3 = vadd.f32 %v461_v2, %v350_v62 }
 0x14e   : > { %748 = vst [vmem:[%s1394_s17] sm:$0xff] %v460_v1 }
 0x14f   : > { %749 = vst [vmem:[%s1394_s17 + $0x8] sm:$0xff] %v462_v3 }
 0x152   : > { %v530_v7 = vpop.f32.mrb[0].mxu1 }
 0x153   : > { %v531_v8 = vadd.f32 %v530_v7, %v354_v5  ;;  %v532_v9 = vpop.f32.mrb[1].mxu1 }
 0x154   : > { %v533_v10 = vadd.f32 %v532_v9, %v358_v6 }
 0x155   : > { %750 = vst [vmem:[%s1394_s17 + $0x10] sm:$0xff] %v531_v8 }
 0x156   : > { %751 = vst [vmem:[%s1394_s17 + $0x18] sm:$0xff] %v533_v10 }
 0x16b   : > { %v601_v15 = vpop.f32.mrb[2].mxu0 }
 0x16c   : > { %v602_v16 = vadd.f32 %v601_v15, %v362_v13  ;;  %v603_v17 = vpop.f32.mrb[3].mxu0 }
 0x16d   : > { %v604_v18 = vadd.f32 %v603_v17, %v366_v14 }
 0x16e   : > { %752 = vst [vmem:[%s1394_s17 + $0x20] sm:$0xff] %v602_v16 }
 0x16f   : > { %753 = vst [vmem:[%s1394_s17 + $0x28] sm:$0xff] %v604_v18 }
 0x172   : > { %v672_v23 = vpop.f32.mrb[2].mxu1 }
 0x173   : > { %v673_v24 = vadd.f32 %v672_v23, %v370_v21  ;;  %v674_v25 = vpop.f32.mrb[3].mxu1 }
 0x174   : > { %v675_v26 = vadd.f32 %v674_v25, %v374_v22 }
 0x175   : > { %754 = vst [vmem:[%s1394_s17 + $0x30] sm:$0xff] %v673_v24 }
 0x176   : > { %755 = vst [vmem:[%s1394_s17 + $0x38] sm:$0xff] %v675_v26 }
 0x18b   : > { %v743_v31 = vpop.f32.mrb[4].mxu0 }
 0x18c   : > { %v744_v32 = vadd.f32 %v743_v31, %v378_v28  ;;  %v745_v33 = vpop.f32.mrb[5].mxu0 }
 0x18d   : > { %v746_v34 = vadd.f32 %v745_v33, %v382_v29 }
 0x18e   : > { %756 = vst [vmem:[%s1394_s17 + $0x40] sm:$0xff] %v744_v32 }
 0x18f   : > { %757 = vst [vmem:[%s1394_s17 + $0x48] sm:$0xff] %v746_v34 }
 0x190   : > { %1158 = shalt.err (!%p1155_p7)
}
 0x191   : > { %s1159_s7 = scalar_lea.hbm %s1409_s30, 1280  ;;  %s1163_s25 = scalar_lea.hbm %s1456_s2, 5120 }
 0x192   : > { %p1160_p9 = scmp.ne.s32.totalorder %s1409_s30, %s1159_s7  ;;  %p1164_p0 = scmp.lt.u32.totalorder %s1409_s30, %s1456_s2 }
 0x193   : > { %p1165_p10 = scmp.lt.u32.totalorder %s1163_s25, %s1159_s7  ;;  %p1167_p1 = scmp.lt.u32.totalorder %s1159_s7, %s1409_s30 }
 0x194   : > { %p1161_p11 = pnand %p1160_p9, %p1321_p12 }
 0x195   : > { %p1166_p2 = por %p1165_p10, %p1164_p0 }
 0x196   : > { %p1162_p5 = pneg %p1161_p11 }
 0x197   : > { %p1168_p4 = por %p1167_p1, %p1166_p2 }
 0x199   : > { %p1169_p6 = pnand %p1168_p4, %p1162_p5 }
 0x19b   : > { %1172 = shalt.err (!%p1169_p6)
}
 0x19c   : > { %1033 = dma.vmem_to_hbm [thread:$0]  (%p1321_p12), %s1411_s22, 1280, %s1409_s30, %s759_s3  }
 0x19d PF: > { %p1050_p8 = scmp.ge.s32.totalorder %s1215_s12, 2  ;;  %s785_s19 = sand.u32 1, %s1203_s9  }
 0x19e   : > { %p1471_p13 = scmp.ne.s32.totalorder %s1461_s16, 0  ;;  %s786_s29 = scalar_lea.sflag [#allocation4], %s785_s19 }
 0x1a0   : > { %p1044_p3 = pnand %p1050_p8, %p1471_p13 }
 0x1a2   : > { %1198 = dma.done.wait (!%p1044_p3), %s786_s29, 1280  }
 0x1a3   : > { %1200 = vsyncadd (!%p1044_p3), %s786_s29, 4294966016  ;;  %p16_p7 = scmp.ge.s32.totalorder %s1291_s21, 6   ;;  %s1472_s9 = smov %s1207_s10 }
 0x1a4   : > { %s1473_s10 = smov %s1211_s11  ;;  %s1474_s11 = smov %s1317_s8 }
 0x1a5   : > { %s1475_s12 = smov %s1291_s21  ;;  %18 = sbr.rel (!%p16_p7) target bundleno = 6 (0x6), region = 79 }
 0x1ac   :  { %791 = vsyncpa [#allocation3], 1 }
 0x1ad   :  { %793 = vsyncpa [#allocation3 + $0x1], 1 }
 0x1ae   :  { %794 = vsyncpa [#allocation6], 1 }
 0x1af   :  { %795 = vsyncpa [#allocation4], 1 }
 0x1b0   :  { %797 = vsyncpa [#allocation4 + $0x1], 1 }

</bundles_post_ra>
